<compile_context>
chip_gen: v5e
topology: v5e:2x2
jax: 0.10.0
libtpu: 0.0.40
codegen_flags: <defaults>
</compile_context>

<pallas_src>
import math

import jax
import jax.numpy as jnp
from jax.experimental import pallas as pl
from jax.experimental.pallas import tpu as pltpu


def _round_up(x, m):
    return (x + m - 1) // m * m


# -----------------------------------------------------------------------------
# Kernel
# -----------------------------------------------------------------------------
def timestep_embedder_kernel(t_ref, freqs_ref, w1_ref, b1_ref, w2_ref, b2_ref,
                             out_ref, h_ref):
    # Grid: (batch tiles i, output-column tiles j).  Per-block shapes:
    #   t_ref:     (tn, 1)        f32
    #   freqs_ref: (1, half)      f32
    #   w1_ref:    (2*half, Hp)   bf16   rows = [cos-half ; sin-half]
    #   b1_ref:    (1, Hp)        f32
    #   w2_ref:    (Hp, tc)       bf16
    #   b2_ref:    (1, tc)        f32
    #   out_ref:   (tn, tc)       out_dtype
    #   h_ref:     (tn, Hp)       bf16 VMEM scratch (SiLU activations)
    j = pl.program_id(1)

    @pl.when(j == 0)
    def _():
        # Sinusoidal embedding + Linear-1 + SiLU, once per batch tile.
        args = t_ref[...] * freqs_ref[...]                      # (tn, half)
        emb = jnp.concatenate(
            [jnp.cos(args).astype(w1_ref.dtype),
             jnp.sin(args).astype(w1_ref.dtype)], axis=-1)      # (tn, 2*half)
        # Single K = 2*half matmul (lane-aligned concat when half % 128 == 0).
        h = jnp.dot(emb, w1_ref[...], preferred_element_type=jnp.float32)
        h = h + b1_ref[...]
        # SiLU in f32; the divide goes to the otherwise-idle EUP slot.
        h = h * pl.reciprocal(1.0 + jnp.exp(-h), approx=True)
        h_ref[...] = h.astype(h_ref.dtype)

    # Linear-2 on the current output-column block, reusing the h scratch.
    o = jnp.dot(h_ref[...], w2_ref[...], preferred_element_type=jnp.float32)
    o = o + b2_ref[...]
    out_ref[...] = o.astype(out_ref.dtype)


# -----------------------------------------------------------------------------
# One-time parameter preparation (padding + cast hoisted out of the call path)
# -----------------------------------------------------------------------------
def prepare_params(freqs, w1, b1, w2, b2, *, matmul_dtype=jnp.bfloat16):
    """w1: (frequency_embedding_size, hidden), w2: (hidden, hidden); both stored
    transposed (in, out) so the kernel computes x @ W + b.  Call once and reuse
    the returned dict across timestep_embedder calls."""
    half = freqs.shape[0]
    hidden = w2.shape[1]
    hp = _round_up(hidden, 128)
    pad_h = hp - hidden
    # For odd frequency_embedding_size the PyTorch module appends a zero column
    # to the embedding; it multiplies w1[2*half] and contributes nothing, so
    # that row is dropped.  Rows [0:half] are the cos weights and [half:2*half]
    # the sin weights, matching the in-kernel [cos | sin] concat order.
    w1f = jnp.pad(w1[:2 * half], ((0, 0), (0, pad_h))).astype(matmul_dtype)
    w2p = jnp.pad(w2, ((0, pad_h), (0, pad_h))).astype(matmul_dtype)
    b1p = jnp.pad(b1.astype(jnp.float32), (0, pad_h)).reshape(1, hp)
    b2p = jnp.pad(b2.astype(jnp.float32), (0, pad_h)).reshape(1, hp)
    freqs2d = freqs.astype(jnp.float32).reshape(1, half)
    # Padded hidden columns: w1/b1 pads are zero -> h_pad = SiLU(0) = 0, so the
    # zero-padded extra rows of w2 see zero activations; padded output columns
    # are sliced off in the wrapper.
    return dict(freqs=freqs2d, w1=w1f, b1=b1p, w2=w2p, b2=b2p,
                half=half, hidden=hidden, hp=hp,
                matmul_dtype=jnp.dtype(matmul_dtype))


# -----------------------------------------------------------------------------
# Wrapper
# -----------------------------------------------------------------------------
def _vmem_ceiling_bytes():
    """Generation-aware VMEM budget with headroom for compiler scratch/spill."""
    try:
        cap = int(pltpu.get_tpu_info().vmem_capacity_bytes)
    except Exception:                       # no device / old runtime: be safe
        cap = 64 << 20                      # valid on every generation (v7x TC)
    return max(min(cap - (12 << 20), 112 << 20), 16 << 20)


def _vmem_usage(tn, hp, half, tc, w_bytes, out_bytes, w2_bufs):
    return (half * 4                               # freqs   (single buffer)
            + 2 * half * hp * w_bytes              # w1      (single buffer)
            + hp * 4                               # b1      (single buffer)
            + w2_bufs * (hp * tc * w_bytes         # w2
                         + tc * 4)                 # b2
            + 2 * tn * 4                           # t       (double buffer)
            + 2 * tn * tc * out_bytes              # out     (double buffer)
            + tn * hp * w_bytes                    # h scratch
            + 4 * tn * hp * 4)                     # f32 intermediates headroom


def timestep_embedder(t, params, *, tile_n=512, out_dtype=jnp.float32):
    """t: (N,) float timesteps; returns (N, hidden) in out_dtype."""
    n = t.shape[0]
    half, hidden, hp = params["half"], params["hidden"], params["hp"]
    w_bytes = params["matmul_dtype"].itemsize
    out_bytes = jnp.dtype(out_dtype).itemsize

    # ---- adaptive batch tiling ---------------------------------------------
    num_tiles = pl.cdiv(n, tile_n)
    if n > 16:
        num_tiles = max(num_tiles, 2)       # >=2 grid steps -> both v7x cores
    tn = _round_up(pl.cdiv(n, num_tiles), 8)
    np_rows = _round_up(n, tn)
    grid_n = np_rows // tn
    t2d = jnp.pad(t.astype(jnp.float32), (0, np_rows - n)).reshape(np_rows, 1)

    # ---- column tiling of w2 so the working set fits resident VMEM ---------
    ceiling = _vmem_ceiling_bytes()
    tc = None
    for cand in range(hp, 0, -128):
        if hp % cand:
            continue
        bufs = 1 if cand == hp else 2
        if _vmem_usage(tn, hp, half, cand, w_bytes, out_bytes, bufs) <= ceiling:
            tc = cand
            break
    if tc is None:
        # TODO(synk): for extreme hidden sizes also shrink tn / stream h via HBM.
        tc = 128
    grid_c = hp // tc
    est = _vmem_usage(tn, hp, half, tc, w_bytes, out_bytes,
                      1 if grid_c == 1 else 2)
    vmem_limit = int(min(max(2 * est, 16 << 20), ceiling))

    const1 = pl.Buffered(1)                               # constant-index blocks
    w2_mode = pl.Buffered(1) if grid_c == 1 else pl.Buffered(2)

    out_padded = pl.pallas_call(
        timestep_embedder_kernel,
        out_shape=jax.ShapeDtypeStruct((np_rows, hp), out_dtype),
        grid=(grid_n, grid_c),
        in_specs=[
            pl.BlockSpec((tn, 1), lambda i, j: (i, 0)),                  # t
            pl.BlockSpec((1, half), lambda i, j: (0, 0),
                         pipeline_mode=const1),                          # freqs
            pl.BlockSpec((2 * half, hp), lambda i, j: (0, 0),
                         pipeline_mode=const1),                          # w1
            pl.BlockSpec((1, hp), lambda i, j: (0, 0),
                         pipeline_mode=const1),                          # b1
            pl.BlockSpec((hp, tc), lambda i, j: (0, j),
                         pipeline_mode=w2_mode),                         # w2
            pl.BlockSpec((1, tc), lambda i, j: (0, j),
                         pipeline_mode=w2_mode),                         # b2
        ],
        out_specs=pl.BlockSpec((tn, tc), lambda i, j: (i, j)),
        scratch_shapes=[pltpu.VMEM((tn, hp), params["matmul_dtype"])],
        compiler_params=pltpu.CompilerParams(
            dimension_semantics=("parallel", "arbitrary"),
            vmem_limit_bytes=vmem_limit),
    )(t2d, params["freqs"], params["w1"], params["b1"],
      params["w2"], params["b2"])

    return out_padded[:n, :hidden]


# -----------------------------------------------------------------------------
# Synthetic parameters / reference
# -----------------------------------------------------------------------------
def make_params(key, hidden_size, frequency_embedding_size=256):
    """Deterministic synthetic parameters (same shapes as the nn.Module)."""
    k1, k2, k3, k4 = jax.random.split(key, 4)
    # PyTorch stores weight as (out, in); we store transposed (in, out).
    w1 = (0.02 * jax.random.normal(
        k1, (frequency_embedding_size, hidden_size))).astype(jnp.float32)
    w2 = (0.02 * jax.random.normal(
        k2, (hidden_size, hidden_size))).astype(jnp.float32)
    bound1 = 1.0 / math.sqrt(frequency_embedding_size)
    bound2 = 1.0 / math.sqrt(hidden_size)
    b1 = jax.random.uniform(k3, (hidden_size,), minval=-bound1,
                            maxval=bound1).astype(jnp.float32)
    b2 = jax.random.uniform(k4, (hidden_size,), minval=-bound2,
                            maxval=bound2).astype(jnp.float32)
    return w1, b1, w2, b2


def make_freqs(frequency_embedding_size=256, max_period=10000):
    half = frequency_embedding_size // 2
    return jnp.exp(
        -math.log(max_period)
        * jnp.arange(half, dtype=jnp.float32) / half).astype(jnp.float32)


def reference(t, freqs, w1, b1, w2, b2):
    """Pure-JAX f32 reference of the PyTorch forward."""
    args = t.astype(jnp.float32)[:, None] * freqs[None, :]
    emb = jnp.concatenate([jnp.cos(args), jnp.sin(args)], axis=-1)
    h = emb @ w1[:emb.shape[1]] + b1
    h = h * jax.nn.sigmoid(h)
    return h @ w2 + b2


if __name__ == "__main__":
    hidden_size = 32
    freq_emb_size = 256
    batch = 8

    key = jax.random.PRNGKey(0)
    k_t, k_p, k_t2 = jax.random.split(key, 3)

    # Fractional timesteps, one per batch element.
    t = jax.random.uniform(k_t, (batch,), minval=0.0, maxval=1000.0).astype(
        jnp.float32)

    freqs = make_freqs(freq_emb_size)
    w1, b1, w2, b2 = make_params(k_p, hidden_size, freq_emb_size)

    # One-time parameter prep (pad + bf16 cast), reused across calls.
    params = prepare_params(freqs, w1, b1, w2, b2)

    out = timestep_embedder(t, params)
    out = jax.block_until_ready(out)
    ref = reference(t, freqs, w1, b1, w2, b2)
    assert out.shape == (batch, hidden_size)
    # bf16 matmul operands with f32 accumulation -> loose-ish tolerance vs f32.
    assert jnp.allclose(out, ref, atol=2e-2, rtol=2e-2)

    # Second config: batch larger than the tile to exercise the grid + padding
    # (300 -> two tiles of 152 rows; both TensorCores get work on v7x).
    batch2 = 300
    t2 = jax.random.uniform(k_t2, (batch2,), minval=0.0, maxval=1000.0).astype(
        jnp.float32)
    out2 = jax.block_until_ready(timestep_embedder(t2, params))
    ref2 = reference(t2, freqs, w1, b1, w2, b2)
    assert out2.shape == (batch2, hidden_size)
    assert jnp.allclose(out2, ref2, atol=2e-2, rtol=2e-2)

    print("KERNEL_OK")
</pallas_src>

<mosaic_0001>
module attributes {stable_mosaic.version = 11 : i64} {
  func.func @timestep_embedder_kernel(%arg0: i32, %arg1: i32, %arg2: memref<8x1xf32, #tpu.memory_space<vmem>>, %arg3: memref<1x128xf32, #tpu.memory_space<vmem>>, %arg4: memref<256x128xbf16, #tpu.memory_space<vmem>>, %arg5: memref<1x128xf32, #tpu.memory_space<vmem>>, %arg6: memref<128x128xbf16, #tpu.memory_space<vmem>>, %arg7: memref<1x128xf32, #tpu.memory_space<vmem>>, %arg8: memref<8x128xf32, #tpu.memory_space<vmem>>, %arg9: memref<8x128xbf16, #tpu.memory_space<vmem>>) attributes {dimension_semantics = [#tpu.dimension_semantics<parallel>, #tpu.dimension_semantics<arbitrary>], iteration_bounds = array<i64: 1, 1>, scalar_prefetch = 0 : i64, scratch_operands = 1 : i64, tpu.core_type = #tpu.core_type<tc>, window_params = [{transform_indices = @transform_0, window_bounds = array<i64: 8, 1>}, {pipeline_mode = #tpu.pipeline_mode<synchronous>, transform_indices = @transform_1, window_bounds = array<i64: 1, 128>}, {pipeline_mode = #tpu.pipeline_mode<synchronous>, transform_indices = @transform_2, window_bounds = array<i64: 256, 128>}, {pipeline_mode = #tpu.pipeline_mode<synchronous>, transform_indices = @transform_3, window_bounds = array<i64: 1, 128>}, {pipeline_mode = #tpu.pipeline_mode<synchronous>, transform_indices = @transform_4, window_bounds = array<i64: 128, 128>}, {pipeline_mode = #tpu.pipeline_mode<synchronous>, transform_indices = @transform_5, window_bounds = array<i64: 1, 128>}, {transform_indices = @transform_6, window_bounds = array<i64: 8, 128>}]} {
    %c0_i32 = arith.constant 0 : i32
    %0 = arith.cmpi eq, %arg1, %c0_i32 : i32
    %1 = arith.extui %0 : i1 to i32
    %c0_i32_0 = arith.constant 0 : i32
    %2 = arith.cmpi ne, %1, %c0_i32_0 : i32
    scf.if %2 {
      %c0_8 = arith.constant 0 : index
      %c0_9 = arith.constant 0 : index
      %10 = vector.load %arg2[%c0_8, %c0_9] : memref<8x1xf32, #tpu.memory_space<vmem>>, vector<8x1xf32>
      %c0_10 = arith.constant 0 : index
      %c0_11 = arith.constant 0 : index
      %11 = vector.load %arg3[%c0_10, %c0_11] : memref<1x128xf32, #tpu.memory_space<vmem>>, vector<1x128xf32>
      %12 = vector.broadcast %10 : vector<8x1xf32> to vector<8x128xf32>
      %13 = vector.broadcast %11 : vector<1x128xf32> to vector<8x128xf32>
      %14 = arith.mulf %12, %13 : vector<8x128xf32>
      %15 = math.cos %14 : vector<8x128xf32>
      %16 = arith.truncf %15 : vector<8x128xf32> to vector<8x128xbf16>
      %17 = math.sin %14 : vector<8x128xf32>
      %18 = arith.truncf %17 : vector<8x128xf32> to vector<8x128xbf16>
      %19 = tpu.concatenate %16, %18 in 1 : vector<8x128xbf16>, vector<8x128xbf16> -> vector<8x256xbf16>
      %c0_12 = arith.constant 0 : index
      %c0_13 = arith.constant 0 : index
      %20 = vector.load %arg4[%c0_12, %c0_13] : memref<256x128xbf16, #tpu.memory_space<vmem>>, vector<256x128xbf16>
      %cst_14 = arith.constant dense<0.000000e+00> : vector<8x128xf32>
      %21 = tpu.matmul %19, %20, %cst_14 {dimension_numbers = #tpu.dot_dimension_numbers<[1], [0], [0], [1], [0, 0, 1, 1], [], []>} : vector<8x256xbf16>, vector<256x128xbf16>, vector<8x128xf32> -> vector<8x128xf32>
      %c0_15 = arith.constant 0 : index
      %c0_16 = arith.constant 0 : index
      %22 = vector.load %arg5[%c0_15, %c0_16] : memref<1x128xf32, #tpu.memory_space<vmem>>, vector<1x128xf32>
      %23 = vector.broadcast %22 : vector<1x128xf32> to vector<8x128xf32>
      %24 = arith.addf %21, %23 : vector<8x128xf32>
      %cst_17 = arith.constant 0.000000e+00 : f32
      %25 = vector.broadcast %cst_17 : f32 to vector<8x128xf32>
      %26 = arith.subf %25, %24 : vector<8x128xf32>
      %27 = math.exp %26 : vector<8x128xf32>
      %cst_18 = arith.constant 1.000000e+00 : f32
      %28 = vector.broadcast %cst_18 : f32 to vector<8x128xf32>
      %29 = arith.addf %28, %27 : vector<8x128xf32>
      %30 = tpu.reciprocal %29 {approx = true} : vector<8x128xf32> -> vector<8x128xf32>
      %31 = arith.mulf %24, %30 : vector<8x128xf32>
      %32 = arith.truncf %31 : vector<8x128xf32> to vector<8x128xbf16>
      %c0_19 = arith.constant 0 : index
      %c0_20 = arith.constant 0 : index
      %33 = vector.load %arg9[%c0_19, %c0_20] : memref<8x128xbf16, #tpu.memory_space<vmem>>, vector<8x128xbf16>
      tpu.vector_store %arg9[%c0_19, %c0_20], %32 {strides = array<i32>} : memref<8x128xbf16, #tpu.memory_space<vmem>>, vector<8x128xbf16>,
    } else {
    }
    %c0 = arith.constant 0 : index
    %c0_1 = arith.constant 0 : index
    %3 = vector.load %arg9[%c0, %c0_1] : memref<8x128xbf16, #tpu.memory_space<vmem>>, vector<8x128xbf16>
    %c0_2 = arith.constant 0 : index
    %c0_3 = arith.constant 0 : index
    %4 = vector.load %arg6[%c0_2, %c0_3] : memref<128x128xbf16, #tpu.memory_space<vmem>>, vector<128x128xbf16>
    %cst = arith.constant dense<0.000000e+00> : vector<8x128xf32>
    %5 = tpu.matmul %3, %4, %cst {dimension_numbers = #tpu.dot_dimension_numbers<[1], [0], [0], [1], [0, 0, 1, 1], [], []>} : vector<8x128xbf16>, vector<128x128xbf16>, vector<8x128xf32> -> vector<8x128xf32>
    %c0_4 = arith.constant 0 : index
    %c0_5 = arith.constant 0 : index
    %6 = vector.load %arg7[%c0_4, %c0_5] : memref<1x128xf32, #tpu.memory_space<vmem>>, vector<1x128xf32>
    %7 = vector.broadcast %6 : vector<1x128xf32> to vector<8x128xf32>
    %8 = arith.addf %5, %7 : vector<8x128xf32>
    %c0_6 = arith.constant 0 : index
    %c0_7 = arith.constant 0 : index
    %9 = vector.load %arg8[%c0_6, %c0_7] : memref<8x128xf32, #tpu.memory_space<vmem>>, vector<8x128xf32>
    tpu.vector_store %arg8[%c0_6, %c0_7], %8 {strides = array<i32>} : memref<8x128xf32, #tpu.memory_space<vmem>>, vector<8x128xf32>,
    return
  }
  func.func @transform_0(%arg0: i32, %arg1: i32) -> (i32, i32) {
    %c0_i32 = arith.constant 0 : i32
    %c0_i32_0 = arith.constant 0 : i32
    return %arg0, %c0_i32 : i32, i32
  }
  func.func @transform_1(%arg0: i32, %arg1: i32) -> (i32, i32) {
    %c0_i32 = arith.constant 0 : i32
    %c0_i32_0 = arith.constant 0 : i32
    %c0_i32_1 = arith.constant 0 : i32
    return %c0_i32, %c0_i32_0 : i32, i32
  }
  func.func @transform_2(%arg0: i32, %arg1: i32) -> (i32, i32) {
    %c0_i32 = arith.constant 0 : i32
    %c0_i32_0 = arith.constant 0 : i32
    %c0_i32_1 = arith.constant 0 : i32
    return %c0_i32, %c0_i32_0 : i32, i32
  }
  func.func @transform_3(%arg0: i32, %arg1: i32) -> (i32, i32) {
    %c0_i32 = arith.constant 0 : i32
    %c0_i32_0 = arith.constant 0 : i32
    %c0_i32_1 = arith.constant 0 : i32
    return %c0_i32, %c0_i32_0 : i32, i32
  }
  func.func @transform_4(%arg0: i32, %arg1: i32) -> (i32, i32) {
    %c0_i32 = arith.constant 0 : i32
    %c0_i32_0 = arith.constant 0 : i32
    return %c0_i32, %arg1 : i32, i32
  }
  func.func @transform_5(%arg0: i32, %arg1: i32) -> (i32, i32) {
    %c0_i32 = arith.constant 0 : i32
    %c0_i32_0 = arith.constant 0 : i32
    return %c0_i32, %arg1 : i32, i32
  }
  func.func @transform_6(%arg0: i32, %arg1: i32) -> (i32, i32) {
    %c0_i32 = arith.constant 0 : i32
    return %arg0, %arg1 : i32, i32
  }
}

</mosaic_0001>

<bundles_post_ra>
// kernel: tpu_custom_call.1
= control target key start
LH: loop header
LB: loop body
LE: loop exit
PB: predicated region body
PF: predicated region fallthrough
CT: control target
= control target key end

     0   :  { %11 = vsyncpa [#allocation4], 0  ;;  %s1002_s0 = inlined_call_operand.vmem [shape: f32[8,1], index: 0, kind: input, shape index: {}]   ;;  %s1003_s1 = inlined_call_operand.vmem [shape: f32[1,128], index: 1, kind: input, shape index: {}]   ;;  %s1004_s2 = inlined_call_operand.hbm [shape: bf16[256,128], index: 2, kind: input, shape index: {}]   ;;  %s1005_s3 = inlined_call_operand.vmem [shape: f32[1,128], index: 3, kind: input, shape index: {}]   ;;  %s1006_s4 = inlined_call_operand.hbm [shape: bf16[128,128], index: 4, kind: input, shape index: {}]   ;;  %s1007_s5 = inlined_call_operand.vmem [shape: f32[1,128], index: 5, kind: input, shape index: {}]   ;;  %s1008_s6 = inlined_call_operand.hbm [shape: f32[8,128], index: 6, kind: output, shape index: {}]  }
   0x1   :  { %12 = vsyncpa [#allocation7], 0 }
   0x2   :  { %13 = vsyncpa [#allocation5], 0  ;;  %s22_s23 = sshll.u32 %s1004_s2, 4  ;;  %s873_s24 = smov [#allocation3]   ;;  %s23_s23 = int_to_ptr.hbm [resolvable:$true] %s22_s23 }
   0x3   :  { %s24_s25 = sshll.u32 %s873_s24, 4  ;;  %s37_s28 = sshll.u32 %s1006_s4, 4  ;;  %s25_s25 = int_to_ptr.vmem [resolvable:$true] %s24_s25  ;;  %s38_s28 = int_to_ptr.hbm [resolvable:$true] %s37_s28 }
   0x4   :  { %s874_s29 = smov 64   ;;  %s875_s30 = smov 4  }
   0x5   :  { %30 = dma.hbm_to_vmem [thread:$0]  %s23_s23, 2048, %s25_s25, [#allocation4], %s874_s29, %s874_s29, %s875_s30  }
   0x6   :  { %s876_s7 = smov [#allocation6]  }
   0x7   :  { %s39_s8 = sshll.u32 %s876_s7, 4  ;;  %s40_s8 = int_to_ptr.vmem [resolvable:$true] %s39_s8 }
   0x8   :  { %45 = dma.hbm_to_vmem [thread:$0]  %s38_s28, 1024, %s40_s8, [#allocation7], %s874_s29, %s874_s29, %s875_s30  }
   0x9   :  { %867 = dma.done.wait [#allocation4], 2048  }
   0xa   :  { %868 = vsyncadd [#allocation4], 4294965248 }
   0xb   :  { %869 = dma.done.wait [#allocation7], 1024  }
   0xc   :  { %870 = vsyncadd [#allocation7], 4294966272  ;;  %v877_v0 = vmov 0   ;;  %v60_v1 = vld [vmem:[%s1002_s0] sm:$0xff]  ;;  %v757_v4 = vld [vmem:[#allocation3 + $0x30] sm:$0xff]  ;;  %s884_s12 = smov [#allocation8]  }
   0xd   :  { %787 = vset.pattern.permute.xlu0 %v877_v0  ;;  %v758_v2 = vld [vmem:[#allocation3 + $0x38] sm:$0xff]  ;;  %v765_v5 = vld [vmem:[#allocation3 + $0x70] sm:$0xff]  ;;  %v756_v7 = vld [vmem:[#allocation3 + $0x28] sm:$0xff]  ;;  %v878_v30 = vmov 683565275   ;;  %s636_s13 = sshll.u32 %s884_s12, 4  ;;  %s637_s13 = int_to_ptr.vmem [resolvable:$true] %s636_s13 }
   0xe   :  { %64 = vperm.xlu0 %787, %v60_v1   ;;  %v766_v3 = vld [vmem:[#allocation3 + $0x78] sm:$0xff]  ;;  %514 = vmatpush.bf16.msra.mxu0 %v758_v2  ;;  %v764_v8 = vld [vmem:[#allocation3 + $0x68] sm:$0xff]  ;;  %v755_v11 = vld [vmem:[#allocation3 + $0x20] sm:$0xff]  ;;  %v879_v32 = vmov 2475754826   ;;  %s638_s16 = sshll.u32 %s1008_s6, 4  ;;  %s639_s16 = int_to_ptr.hbm [resolvable:$true] %s638_s16 }
   0xf   :  { %527 = vmatpush.bf16.msra.mxu1 %v766_v3  ;;  %v788_v6 = vld [vmem:[%s1003_s1] ss:$0 sm:$0xff]  ;;  %v763_v12 = vld [vmem:[#allocation3 + $0x60] sm:$0xff]  ;;  %v753_v20 = vld [vmem:[#allocation3 + $0x10] sm:$0xff]  ;;  %v880_v34 = vmov 2131351028  }
  0x10   :  { %v754_v15 = vld [vmem:[#allocation3 + $0x18] sm:$0xff]  ;;  %v761_v21 = vld [vmem:[#allocation3 + $0x50] sm:$0xff]  ;;  %v752_v25 = vld [vmem:[#allocation3 + $0x8] sm:$0xff]  ;;  %v881_v36 = vmov 2102212464  }
  0x11   :  { %v762_v16 = vld [vmem:[#allocation3 + $0x58] sm:$0xff]  ;;  %v760_v27 = vld [vmem:[#allocation3 + $0x48] sm:$0xff]  ;;  %v882_v41 = vmov 920167782   ;;  %v751_v43 = vld [vmem:[#allocation3] sm:$0xff] }
  0x12   :  { %515 = vmatpush.bf16.msra.mxu0 %v757_v4  ;;  %v883_v45 = vmov 1326507024   ;;  %v759_v48 = vld [vmem:[#allocation3 + $0x40] sm:$0xff] }
  0x13   :  { %528 = vmatpush.bf16.msra.mxu1 %v765_v5 }
  0x16   :  { %516 = vmatpush.bf16.msra.mxu0 %v756_v7 }
  0x17   :  { %529 = vmatpush.bf16.msra.mxu1 %v764_v8 }
  0x1a   :  { %517 = vmatpush.bf16.msra.mxu0 %v755_v11 }
  0x1b   :  { %530 = vmatpush.bf16.msra.mxu1 %v763_v12 }
  0x1e   :  { %518 = vmatpush.bf16.msra.mxu0 %v754_v15 }
  0x1f   :  { %531 = vmatpush.bf16.msra.mxu1 %v762_v16 }
  0x22   :  { %519 = vmatpush.bf16.msra.mxu0 %v753_v20 }
  0x23   :  { %532 = vmatpush.bf16.msra.mxu1 %v761_v21 }
  0x26   :  { %520 = vmatpush.bf16.msra.mxu0 %v752_v25 }
  0x27   :  { %533 = vmatpush.bf16.msra.mxu1 %v760_v27 }
  0x2a   :  { %521 = vmatpush.bf16.msra.mxu0 %v751_v43 }
  0x2b   :  { %534 = vmatpush.bf16.msra.mxu1 %v759_v48 }
  0x80   :  { %v65_v9 = vpop.permute.xlu0 %64 }
  0x81   :  { %v933_v10 = vmul.f32 %v788_v6, %v65_v9 }
  0x83   :  { %v74_v13 = vand.u32 2139095040, %v933_v10  ;;  %v71_v17 = vand.u32 2147483647, %v933_v10  ;;  %vm73_vm12 = vcmp.lt.s32.totalorder %v933_v10, 0 }
  0x85   :  { %v75_v14 = vshrl.u32 %v74_v13, 23  ;;  %v78_v22 = vand.u32 8388607, %v71_v17  ;;  %vm72_vm13 = vcmp.le.f32.partialorder %v71_v17, 0.7853982 }
  0x87   :  { %v649_v18 = vadd.s32 4294967169, %v75_v14  ;;  %v79_v26 = vor.u32 8388608, %v78_v22 }
  0x89   :  { %v81_v19 = vadd.s32 1, %v649_v18  ;;  %v949_v47 = vshll.u32 %v79_v26, 8 }
  0x8b   :  { %vm82_vm0 = vcmp.gt.s32.totalorder %v81_v19, 0  ;;  %v120_v60 = vand.u32 65535, %v949_v47  ;;  %v121_v62 = vshrl.u32 %v949_v47, 16 }
  0x8c   :  { %v83_v23 = vsel %vm82_vm0, %v81_v19, 0 }
  0x8d   :  { %v85_v24 = vand.u32 31, %v83_v23  ;;  %v939_v28 = vshrl.u32 %v83_v23, 5 }
  0x8f   :  { %v941_v29 = vsub.s32 32, %v85_v24  ;;  %v88_v31 = vshll.u32 %v878_v30, %v85_v24  ;;  %v91_v33 = vshll.u32 %v879_v32, %v85_v24  ;;  %v94_v35 = vshll.u32 %v880_v34, %v85_v24 }
  0x90   :  { %v97_v37 = vshll.u32 %v881_v36, %v85_v24  ;;  %v100_v44 = vshll.u32 %v882_v41, %v85_v24  ;;  %vm103_vm1 = vcmp.lt.s32.totalorder %v939_v28, 1  ;;  %vm106_vm2 = vcmp.lt.s32.totalorder %v939_v28, 4 }
  0x91   :  { %v89_v38 = vshrl.u32 %v879_v32, %v941_v29  ;;  %v92_v39 = vshrl.u32 %v880_v34, %v941_v29  ;;  %v95_v40 = vshrl.u32 %v881_v36, %v941_v29  ;;  %v98_v42 = vshrl.u32 %v882_v41, %v941_v29 }
  0x92   :  { %v101_v46 = vshrl.u32 %v883_v45, %v941_v29  ;;  %vm105_vm3 = vcmp.lt.s32.totalorder %v939_v28, 3  ;;  %vm104_vm4 = vcmp.lt.s32.totalorder %v939_v28, 2  ;;  %v87_v25 = vshrl.u32 %v878_v30, %v941_v29 }
  0x93   :  { %v90_v49 = vor.u32 %v89_v38, %v88_v31  ;;  %v93_v50 = vor.u32 %v92_v39, %v91_v33  ;;  %v96_v51 = vor.u32 %v95_v40, %v94_v35  ;;  %v99_v52 = vor.u32 %v98_v42, %v97_v37 }
  0x94   :  { %v102_v53 = vor.u32 %v101_v46, %v100_v44 }
  0x95   :  { %v111_v54 = vsel %vm103_vm1, %v90_v49, %v93_v50  ;;  %v112_v55 = vsel %vm106_vm2, %v99_v52, 920167782  ;;  %v115_v56 = vsel %vm103_vm1, %v93_v50, %v96_v51  ;;  %v108_v22 = vsel %vm106_vm2, %v96_v51, 2102212464 }
  0x96   :  { %v113_v57 = vsel %vm105_vm3, %v96_v51, %v112_v55  ;;  %v116_v58 = vsel %vm106_vm2, %v102_v53, 1326507024  ;;  %v107_v34 = vsel %vm103_vm1, %v87_v25, %v90_v49  ;;  %v109_v35 = vsel %vm105_vm3, %v93_v50, %v108_v22 }
  0x97   :  { %v117_v59 = vsel %vm105_vm3, %v99_v52, %v116_v58  ;;  %v114_v61 = vsel %vm104_vm4, %v111_v54, %v113_v57  ;;  %v110_v30 = vsel %vm104_vm4, %v107_v34, %v109_v35 }
  0x98   :  { %v118_v63 = vsel %vm104_vm4, %v115_v56, %v117_v59  ;;  %v144_v1 = vand.u32 65535, %v114_v61  ;;  %v145_v2 = vshrl.u32 %v114_v61, 16  ;;  %v164_v44 = vmul.u32 %v949_v47, %v110_v30 }
  0x99   :  { %v122_v3 = vand.u32 65535, %v118_v63  ;;  %v123_v4 = vshrl.u32 %v118_v63, 16  ;;  %vm214_vm4 = vweird.f32 %v933_v10 }
  0x9a   :  { %v147_v5 = vmul.u32 %v145_v2, %v120_v60  ;;  %v148_v6 = vmul.u32 %v144_v1, %v121_v62  ;;  %v146_v9 = vmul.u32 %v144_v1, %v120_v60  ;;  %v149_v14 = vmul.u32 %v145_v2, %v121_v62 }
  0x9b   :  { %v125_v7 = vmul.u32 %v123_v4, %v120_v60  ;;  %v126_v8 = vmul.u32 %v122_v3, %v121_v62  ;;  %v124_v12 = vmul.u32 %v122_v3, %v120_v60  ;;  %v127_v15 = vmul.u32 %v123_v4, %v121_v62 }
  0x9c   :  { %v150_v11 = vshll.u32 %v147_v5, 16  ;;  %v152_v16 = vshll.u32 %v148_v6, 16  ;;  %v151_v32 = vshrl.u32 %v147_v5, 16  ;;  %v153_v38 = vshrl.u32 %v148_v6, 16 }
  0x9d   :  { %v128_v13 = vshll.u32 %v125_v7, 16  ;;  %v130_v19 = vshll.u32 %v126_v8, 16  ;;  %v129_v36 = vshrl.u32 %v125_v7, 16  ;;  %v131_v40 = vshrl.u32 %v126_v8, 16 }
  0x9e   :  { %vm154_vm5 = vc.u32 %v146_v9, %v150_v11  ;;  %v156_v18 = vadd.s32 %v150_v11, %v146_v9 }
  0x9f   :  { %vm132_vm6 = vc.u32 %v124_v12, %v128_v13  ;;  %v134_v20 = vadd.s32 %v128_v13, %v124_v12  ;;  %v155_v21 = vsel %vm154_vm5, 1, %v877_v0 }
  0xa0   :  { %v133_v23 = vsel %vm132_vm6, 1, %v877_v0  ;;  %v157_v24 = vadd.s32 %v155_v21, %v149_v14  ;;  %vm158_vm7 = vc.u32 %v156_v18, %v152_v16 }
  0xa1   :  { %v135_v26 = vadd.s32 %v133_v23, %v127_v15  ;;  %vm136_vm8 = vc.u32 %v134_v20, %v130_v19  ;;  %v159_v27 = vsel %vm158_vm7, 1, %v877_v0 }
  0xa2   :  { %v137_v31 = vsel %vm136_vm8, 1, %v877_v0  ;;  %v161_v33 = vadd.s32 %v159_v27, %v157_v24  ;;  %v160_v0 = vadd.s32 %v156_v18, %v152_v16 }
  0xa3   :  { %v139_v37 = vadd.s32 %v137_v31, %v135_v26 }
  0xa4   :  { %v162_v39 = vadd.s32 %v161_v33, %v151_v32 }
  0xa5   :  { %v140_v29 = vadd.s32 %v139_v37, %v129_v36 }
  0xa6   :  { %v163_v41 = vadd.s32 %v162_v39, %v153_v38 }
  0xa7   :  { %v141_v42 = vadd.s32 %v140_v29, %v131_v40 }
  0xa8   :  { %v167_v43 = vadd.s32 1, %v163_v41 }
  0xa9   :  { %vm166_vm9 = vc.u32 %v141_v42, %v160_v0  ;;  %v165_v56 = vadd.s32 %v160_v0, %v141_v42  ;;  %v773_v42 = vld [vmem:[#allocation6 + $0x30] sm:$0xff]  ;;  %v772_v0 = vld [vmem:[#allocation6 + $0x28] sm:$0xff] }
  0xaa   :  { %v168_v45 = vsel %vm166_vm9, %v167_v43, %v163_v41  ;;  %v774_v41 = vld [vmem:[#allocation6 + $0x38] sm:$0xff]  ;;  %v771_v43 = vld [vmem:[#allocation6 + $0x20] sm:$0xff] }
  0xab   :  { %v169_v46 = vadd.s32 %v168_v45, %v164_v44  ;;  %617 = vmatpush.bf16.msra.mxu2 %v774_v41  ;;  %v770_v44 = vld [vmem:[#allocation6 + $0x18] sm:$0xff]  ;;  %v769_v45 = vld [vmem:[#allocation6 + $0x10] sm:$0xff] }
  0xad   :  { %v170_v48 = vadd.s32 536870912, %v169_v46 }
  0xaf   :  { %v171_v49 = vshrl.u32 %v170_v48, 30  ;;  %618 = vmatpush.bf16.msra.mxu2 %v773_v42 }
  0xb1   :  { %v172_v50 = vshll.u32 %v171_v49, 30  ;;  %v195_v6 = vsub.s32 4, %v171_v49 }
  0xb3   :  { %v173_v51 = vsub.s32 %v169_v46, %v172_v50  ;;  %v196_v12 = vsel %vm73_vm12, %v195_v6, %v171_v49  ;;  %619 = vmatpush.bf16.msra.mxu2 %v772_v0  ;;  %v768_v46 = vld [vmem:[#allocation6 + $0x8] sm:$0xff] }
  0xb4   :  { %v198_v15 = vsel %vm72_vm13, 0, %v196_v12 }
  0xb5   :  { %vm174_vm10 = vcmp.lt.s32.totalorder %v173_v51, 0  ;;  %v175_v52 = vsub.s32 0, %v173_v51  ;;  %v370_v21 = vadd.s32 3, %v198_v15  ;;  %v215_v25 = vand.u32 3, %v198_v15 }
  0xb7   :  { %v176_v53 = vsel %vm174_vm10, %v175_v52, %v173_v51  ;;  %v371_v26 = vand.u32 3, %v370_v21  ;;  %vm216_vm14 = vcmp.lt.s32.totalorder %v215_v25, 2  ;;  %vm217_vm15 = vcmp.eq.s32.totalorder %v215_v25, 0  ;;  %620 = vmatpush.bf16.msra.mxu2 %v771_v43 }
  0xb8   :  { %v177_v54 = vclz %v176_v53  ;;  %vm220_vm0 = vcmp.eq.s32.totalorder %v215_v25, 2 }
  0xb9   :  { %vm372_vm1 = vcmp.lt.s32.totalorder %v371_v26, 2  ;;  %vm373_vm2 = vcmp.eq.s32.totalorder %v371_v26, 0  ;;  %vm376_vm3 = vcmp.eq.s32.totalorder %v371_v26, 2 }
  0xba   :  { %v650_v55 = vadd.s32 4294967294, %v177_v54 }
  0xbb   :  { %621 = vmatpush.bf16.msra.mxu2 %v770_v44 }
  0xbc   :  { %vm651_vm11 = vcmp.lt.s32.totalorder %v650_v55, 0 }
  0xbd   :  { %v180_v28 = vsel %vm651_vm11, 0, %v650_v55 }
  0xbe   :  { %v181_v57 = vsub.s32 32, %v180_v28  ;;  %v185_v58 = vsub.s32 4294967266, %v180_v28  ;;  %v182_v59 = vshll.u32 %v173_v51, %v180_v28  ;;  %v767_v51 = vld [vmem:[#allocation6] sm:$0xff] }
  0xbf   :  { %622 = vmatpush.bf16.msra.mxu2 %v769_v45 }
  0xc0   :  { %v183_v60 = vshrl.u32 %v165_v56, %v181_v57  ;;  %v186_v47 = vadd.s32 127, %v185_v58 }
  0xc2   :  { %v184_v61 = vor.u32 %v183_v60, %v182_v59  ;;  %v187_v62 = vshll.u32 %v186_v47, 23 }
  0xc3   :  { %623 = vmatpush.bf16.msra.mxu2 %v768_v46 }
  0xc4   :  { %v188_v63 = vor.u32 4788187, %v187_v62  ;;  %v191_v2 = vcvt.s32.f32 %v184_v61  ;;  %v790_v61 = vld [vmem:[%s1007_s5] ss:$0 sm:$0xff] }
  0xc6   :  { %v189_v1 = vand.u32 2147483647, %v188_v63 }
  0xc7   :  { %624 = vmatpush.bf16.msra.mxu2 %v767_v51 }
  0xc8   :  { %v192_v3 = vmul.f32 %v191_v2, %v189_v1 }
  0xca   :  { %v193_v4 = vxor.u32 2147483648, %v192_v3 }
  0xcc   :  { %v194_v5 = vsel %vm73_vm12, %v193_v4, %v192_v3 }
  0xcd   :  { %v197_v7 = vsel %vm72_vm13, %v933_v10, %v194_v5  ;;  %v789_v10 = vld [vmem:[%s1005_s3] ss:$0 sm:$0xff] }
  0xce   :  { %v199_v8 = vmul.f32 %v197_v7, %v197_v7 }
  0xd0   :  { %v200_v9 = vmul.f32 -0.001358992, %v199_v8  ;;  %v207_v11 = vmul.f32 -0.00019511016, %v199_v8 }
  0xd2   :  { %v201_v13 = vadd.f32 0.041655596, %v200_v9  ;;  %v208_v14 = vadd.f32 0.008332121, %v207_v11 }
  0xd4   :  { %v202_v16 = vmul.f32 %v201_v13, %v199_v8  ;;  %v209_v18 = vmul.f32 %v208_v14, %v199_v8 }
  0xd6   :  { %v203_v19 = vadd.f32 -0.4999988, %v202_v16  ;;  %v210_v20 = vadd.f32 -0.16666654, %v209_v18 }
  0xd8   :  { %v204_v22 = vmul.f32 %v203_v19, %v199_v8  ;;  %v211_v23 = vmul.f32 %v210_v20, %v199_v8 }
  0xda   :  { %v205_v24 = vadd.f32 1.0, %v204_v22  ;;  %v212_v17 = vadd.f32 1.0, %v211_v23 }
  0xdc   :  { %v213_v27 = vmul.f32 %v212_v17, %v197_v7  ;;  %v221_v31 = vxor.u32 2147483648, %v205_v24 }
  0xde   :  { %v218_v32 = vxor.u32 2147483648, %v213_v27  ;;  %v222_v34 = vsel %vm220_vm0, %v221_v31, %v213_v27  ;;  %v378_v36 = vsel %vm376_vm3, %v221_v31, %v213_v27 }
  0xe0   :  { %v219_v33 = vsel %vm217_vm15, %v205_v24, %v218_v32  ;;  %v375_v35 = vsel %vm373_vm2, %v205_v24, %v218_v32 }
  0xe1   :  { %v223_v37 = vsel %vm216_vm14, %v219_v33, %v222_v34  ;;  %v379_v38 = vsel %vm372_vm1, %v375_v35, %v378_v36 }
  0xe2   :  { %v224_v39 = vsel %vm214_vm4, nan, %v223_v37  ;;  %v380_v40 = vsel %vm214_vm4, nan, %v379_v38 }
  0xe3   :  { %v225_v29 = vpack.c.bf16 %v224_v39, %v224_v39  ;;  %v381_v30 = vpack.c.bf16 %v380_v40, %v380_v40 }
  0xe5   :  { %522 = vmatmul.bf16.vlgmr.msra.gmra.mxu0 %v225_v29  ;;  %535 = vmatmul.bf16.vlgmr.msra.gmra.mxu1 %v381_v30 }
 0x162   :  { %v523_v48 = vpop.f32.mrf.mxu0  ;;  %v536_v49 = vpop.f32.mrf.mxu1 }
 0x163   :  { %v524_v50 = vadd.f32 %v789_v10, %v523_v48 }
 0x165   :  { %v537_v52 = vadd.f32 %v536_v49, %v524_v50 }
 0x167   :  { %v540_v53 = vsub.f32 0.0, %v537_v52 }
 0x169   :  { %v541_v54 = vmul.f32 1.442695, %v540_v53 }
 0x16a   :  { %v525_v55 = vpop.f32.mrf.mxu0  ;;  %v538_v28 = vpop.f32.mrf.mxu1 }
 0x16b   :  { %791 = vpow2.f32 %v541_v54 }
 0x171   :  { %v792_v56 = vpop.eup %791 }
 0x172   :  { %v543_v57 = vadd.f32 1.0, %v792_v56 }
 0x174   :  { %793 = vrcp.f32 %v543_v57 }
 0x17a   :  { %v794_v58 = vpop.eup %793 }
 0x17b   :  { %v545_v59 = vmul.f32 %v794_v58, %v537_v52 }
 0x17d   :  { %v546_v60 = vpack.c.bf16 %v545_v59, %v545_v59 }
 0x17f   :  { %547 = vst [vmem:[#allocation2] sm:$0xf] %v546_v60 }
 0x186   :  { %v548_v47 = vld [vmem:[#allocation2] sm:$0xf] }
 0x187   :  { %625 = vmatmul.bf16.vlgmr.msra.gmra.mxu2 %v548_v47 }
 0x20a   :  { %v626_v62 = vpop.f32.mrf.mxu2 }
 0x20b   :  { %v627_v63 = vadd.f32 %v790_v61, %v626_v62 }
 0x20d   :  { %630 = vst [vmem:[#allocation8] sm:$0xff] %v627_v63 }
 0x20e   :  { %641 = dma.vmem_to_hbm [thread:$0]  %s637_s13, 128, %s639_s16, [#allocation5]  }
 0x212   :  { %v628_v1 = vpop.f32.mrf.mxu2 }
 0x213   :  { %871 = dma.done.wait [#allocation5], 128  }
 0x214   :  { %872 = vsyncadd [#allocation5], 4294967168 }
 0x215   :  { %646 = vsyncpa [#allocation4], 1 }
 0x216   :  { %647 = vsyncpa [#allocation7], 1 }
 0x217   :  { %648 = vsyncpa [#allocation5], 1 }

</bundles_post_ra>
